<compile_context>
chip_gen: v6e
topology: v6e:2x2x1
jax: 0.10.0
libtpu: 0.0.40
codegen_flags: <defaults>
</compile_context>

<pallas_src>
import functools

import jax
import jax.numpy as jnp
from jax.experimental import pallas as pl
from jax.experimental.pallas import tpu as pltpu


def _lycoris_linear_kernel(x_ref, wT_ref, w1bT_ref, w1aT_ref, w2bT_ref,
                           w2aT_ref, o_ref, acc_ref):
    k = pl.program_id(2)

    @pl.when(k == 0)
    def _():
        acc_ref[...] = jnp.zeros_like(acc_ref)

    # LoHa delta tile, already in (in, out) layout:
    #   delta^T = (scaling * w1_a @ w1_b)^T ∘ (w2_a @ w2_b)^T
    #           = (w1_b^T @ (scaling*w1_a)^T) ∘ (w2_b^T @ w2_a^T)
    # (scaling folded into the tiny (r, out) factor wrapper-side.)
    d1 = jnp.dot(w1bT_ref[...], w1aT_ref[...],
                 preferred_element_type=jnp.float32)
    d2 = jnp.dot(w2bT_ref[...], w2aT_ref[...],
                 preferred_element_type=jnp.float32)
    # weight_eff tile: base weight + delta   (forward(): weight += delta)
    w_eff = wT_ref[...].astype(jnp.float32) + d1 * d2          # (tk, tn) f32

    x_tile = x_ref[...]
    if x_tile.dtype == jnp.bfloat16:
        # keep bf16 operands on the MXU (v6e/v7x peak is bf16), f32 accumulate
        lhs, rhs = x_tile, w_eff.astype(jnp.bfloat16)
    else:
        lhs, rhs = x_tile.astype(jnp.float32), w_eff
    acc_ref[...] += jnp.dot(lhs, rhs, preferred_element_type=jnp.float32)

    @pl.when(k == pl.num_programs(2) - 1)
    def _():
        # result = result.to(previous_dtype)
        o_ref[...] = acc_ref[...].astype(o_ref.dtype)


def _round_up(v, m):
    return (v + m - 1) // m * m


def _pad2(a, s0, s1):
    p0, p1 = s0 - a.shape[0], s1 - a.shape[1]
    if p0 or p1:
        a = jnp.pad(a, ((0, p0), (0, p1)))
    return a


@functools.partial(jax.jit, static_argnames=("tm", "tn", "tk"))
def lycoris_linear_forward(x, weight, w1_a, w1_b, w2_a, w2_b, scaling,
                           *, tm=256, tn=512, tk=512):
    """Pallas implementation of LycorisLayer.forward (LoHa Linear instance).

    x:      (batch, in_features)
    weight: (out_features, in_features)   (PyTorch nn.Linear layout)
    w1_a/w2_a: (out_features, r), w1_b/w2_b: (r, in_features)
    """
    B, K = x.shape
    N, _ = weight.shape
    r = w1_a.shape[1]

    # ---- wrapper-side layout plumbing (free; keeps the MXU lane-aligned) ----
    wT = weight.T                      # (K, N)
    w1_bT = w1_b.T                     # (K, r)
    w1_aT = (w1_a * scaling).T         # (r, N)  scaling folded in here
    w2_bT = w2_b.T                     # (K, r)
    w2_aT = w2_a.T                     # (r, N)

    # ---- tile selection (fits v5e/v6e/v7x VMEM; lane-dense output) ---------
    tm = min(tm, _round_up(B, 8))      # batch tile, multiple of 8 sublanes
    tn = min(tn, _round_up(N, 128))    # out tile, multiple of 128 lanes
    tk = min(tk, _round_up(K, 128))    # in  tile, multiple of 128 lanes
    Bp, Np, Kp = _round_up(B, tm), _round_up(N, tn), _round_up(K, tk)

    xp = _pad2(x, Bp, Kp)
    wTp = _pad2(wT, Kp, Np)
    w1_bTp = _pad2(w1_bT, Kp, r)
    w1_aTp = _pad2(w1_aT, r, Np)
    w2_bTp = _pad2(w2_bT, Kp, r)
    w2_aTp = _pad2(w2_aT, r, Np)

    grid = (Bp // tm, Np // tn, Kp // tk)

    x_isz = jnp.dtype(x.dtype).itemsize
    w_isz = jnp.dtype(weight.dtype).itemsize
    # VMEM budget: double-buffered tiles + f32 accumulator + f32 temporaries.
    vmem_bytes = (2 * tm * tk * x_isz            # x tile (double-buffered)
                  + 2 * tk * tn * w_isz          # weight^T tile
                  + 4 * (tk * r + r * tn) * 4    # adapter tiles
                  + 2 * tm * tn * x_isz          # output tile
                  + tm * tn * 4                  # accumulator scratch
                  + 4 * tk * tn * 4)             # f32 temps (d1, d2, w_eff)
    vmem_limit = int(min(max(2 * vmem_bytes, 32 * 1024 * 1024),
                         64 * 1024 * 1024))      # safe on v7x's 64 MiB VMEM

    cost = pl.CostEstimate(
        flops=2 * Bp * Np * Kp                       # main matmul
        + (Bp // tm) * 4 * r * Np * Kp               # delta matmuls per b-tile
        + 2 * Kp * Np,                               # Hadamard + add
        transcendentals=0,
        bytes_accessed=(xp.size * x_isz + wTp.size * w_isz
                        + (w1_bTp.size + w1_aTp.size
                           + w2_bTp.size + w2_aTp.size) * 4
                        + Bp * Np * x_isz),
    )

    out = pl.pallas_call(
        _lycoris_linear_kernel,
        out_shape=jax.ShapeDtypeStruct((Bp, Np), x.dtype),
        grid_spec=pltpu.PrefetchScalarGridSpec(
            num_scalar_prefetch=0,
            grid=grid,
            in_specs=[
                pl.BlockSpec((tm, tk), lambda i, j, k: (i, k)),   # x
                pl.BlockSpec((tk, tn), lambda i, j, k: (k, j)),   # weight^T
                pl.BlockSpec((tk, r), lambda i, j, k: (k, 0)),    # w1_b^T
                pl.BlockSpec((r, tn), lambda i, j, k: (0, j)),    # s*w1_a^T
                pl.BlockSpec((tk, r), lambda i, j, k: (k, 0)),    # w2_b^T
                pl.BlockSpec((r, tn), lambda i, j, k: (0, j)),    # w2_a^T
            ],
            out_specs=pl.BlockSpec((tm, tn), lambda i, j, k: (i, j)),
            scratch_shapes=[pltpu.VMEM((tm, tn), jnp.float32)],
        ),
        compiler_params=pltpu.CompilerParams(
            dimension_semantics=("parallel", "parallel", "arbitrary"),
            vmem_limit_bytes=vmem_limit,
        ),
        cost_estimate=cost,
    )(xp, wTp, w1_bTp, w1_aTp, w2_bTp, w2_aTp)

    return out[:B, :N]


def _reference_forward(x, weight, w1_a, w1_b, w2_a, w2_b, scaling):
    delta = scaling * (w1_a @ w1_b) * (w2_a @ w2_b)
    w_eff = weight.astype(jnp.float32) + delta
    return (x.astype(jnp.float32) @ w_eff.T).astype(x.dtype)


if __name__ == "__main__":
    def run_case(batch, in_features, out_features, r, case):
        alpha = 16.0
        scaling = alpha / r                      # LycorisLayer: alpha / r
        key = jax.random.fold_in(jax.random.PRNGKey(0), case)
        kx, kw, k1a, k1b, k2a, k2b = jax.random.split(key, 6)

        x = jax.random.normal(kx, (batch, in_features), dtype=jnp.float32)
        weight = jax.random.normal(
            kw, (out_features, in_features), dtype=jnp.float32) * 0.05
        w1_a = jax.random.normal(k1a, (out_features, r), jnp.float32) * 0.1
        w1_b = jax.random.normal(k1b, (r, in_features), jnp.float32) * 0.1
        w2_a = jax.random.normal(k2a, (out_features, r), jnp.float32) * 0.1
        w2_b = jax.random.normal(k2b, (r, in_features), jnp.float32) * 0.1

        out = lycoris_linear_forward(x, weight, w1_a, w1_b, w2_a, w2_b, scaling)
        out = jax.block_until_ready(out)

        ref = _reference_forward(x, weight, w1_a, w1_b, w2_a, w2_b, scaling)
        assert out.shape == (batch, out_features)
        assert out.dtype == x.dtype
        # NOTE: f32 jnp.dot on the MXU uses multi-pass emulation at default
        # precision; 1e-3 tolerance covers that without masking real bugs.
        assert jnp.allclose(out, ref, atol=1e-3, rtol=1e-3), \
            f"mismatch vs reference (case {case})"

    # aligned shapes (single-tile grid)
    run_case(batch=16, in_features=256, out_features=256, r=8, case=0)
    # unaligned shapes -> exercises wrapper-side zero-padding + slicing
    run_case(batch=5, in_features=200, out_features=136, r=8, case=1)

    # TODO(synk): merge()/unmerge()/scale_layer() and training-time
    # module/rank dropout are stateful host-side bookkeeping with no
    # kernel-side equivalent; only the eval forward path is implemented.
    print("KERNEL_OK")
</pallas_src>

<mosaic_0001>
module attributes {stable_mosaic.version = 11 : i64} {
  func.func @_lycoris_linear_kernel(%arg0: i32, %arg1: i32, %arg2: i32, %arg3: memref<16x256xf32, #tpu.memory_space<vmem>>, %arg4: memref<256x256xf32, #tpu.memory_space<vmem>>, %arg5: memref<256x8xf32, #tpu.memory_space<vmem>>, %arg6: memref<8x256xf32, #tpu.memory_space<vmem>>, %arg7: memref<256x8xf32, #tpu.memory_space<vmem>>, %arg8: memref<8x256xf32, #tpu.memory_space<vmem>>, %arg9: memref<16x256xf32, #tpu.memory_space<vmem>>, %arg10: memref<16x256xf32, #tpu.memory_space<vmem>>) attributes {dimension_semantics = [#tpu.dimension_semantics<parallel>, #tpu.dimension_semantics<parallel>, #tpu.dimension_semantics<arbitrary>], iteration_bounds = array<i64: 1, 1, 1>, scalar_prefetch = 0 : i64, scratch_operands = 1 : i64, tpu.core_type = #tpu.core_type<tc>, window_params = [{transform_indices = @transform_0, window_bounds = array<i64: 16, 256>}, {transform_indices = @transform_1, window_bounds = array<i64: 256, 256>}, {transform_indices = @transform_2, window_bounds = array<i64: 256, 8>}, {transform_indices = @transform_3, window_bounds = array<i64: 8, 256>}, {transform_indices = @transform_4, window_bounds = array<i64: 256, 8>}, {transform_indices = @transform_5, window_bounds = array<i64: 8, 256>}, {transform_indices = @transform_6, window_bounds = array<i64: 16, 256>}]} {
    %c0_i32 = arith.constant 0 : i32
    %0 = arith.cmpi eq, %arg2, %c0_i32 : i32
    %1 = arith.extui %0 : i1 to i32
    %c0_i32_0 = arith.constant 0 : i32
    %2 = arith.cmpi ne, %1, %c0_i32_0 : i32
    scf.if %2 {
      %cst_20 = arith.constant 0.000000e+00 : f32
      %20 = vector.broadcast %cst_20 : f32 to vector<16x256xf32>
      %c0_21 = arith.constant 0 : index
      %c0_22 = arith.constant 0 : index
      %21 = vector.load %arg10[%c0_21, %c0_22] : memref<16x256xf32, #tpu.memory_space<vmem>>, vector<16x256xf32>
      tpu.vector_store %arg10[%c0_21, %c0_22], %20 {strides = array<i32>} : memref<16x256xf32, #tpu.memory_space<vmem>>, vector<16x256xf32>,
    } else {
    }
    %c0 = arith.constant 0 : index
    %c0_1 = arith.constant 0 : index
    %3 = vector.load %arg5[%c0, %c0_1] : memref<256x8xf32, #tpu.memory_space<vmem>>, vector<256x8xf32>
    %c0_2 = arith.constant 0 : index
    %c0_3 = arith.constant 0 : index
    %4 = vector.load %arg6[%c0_2, %c0_3] : memref<8x256xf32, #tpu.memory_space<vmem>>, vector<8x256xf32>
    %cst = arith.constant dense<0.000000e+00> : vector<256x256xf32>
    %5 = tpu.matmul %3, %4, %cst {dimension_numbers = #tpu.dot_dimension_numbers<[1], [0], [0], [1], [0, 0, 1, 1], [], []>} : vector<256x8xf32>, vector<8x256xf32>, vector<256x256xf32> -> vector<256x256xf32>
    %c0_4 = arith.constant 0 : index
    %c0_5 = arith.constant 0 : index
    %6 = vector.load %arg7[%c0_4, %c0_5] : memref<256x8xf32, #tpu.memory_space<vmem>>, vector<256x8xf32>
    %c0_6 = arith.constant 0 : index
    %c0_7 = arith.constant 0 : index
    %7 = vector.load %arg8[%c0_6, %c0_7] : memref<8x256xf32, #tpu.memory_space<vmem>>, vector<8x256xf32>
    %cst_8 = arith.constant dense<0.000000e+00> : vector<256x256xf32>
    %8 = tpu.matmul %6, %7, %cst_8 {dimension_numbers = #tpu.dot_dimension_numbers<[1], [0], [0], [1], [0, 0, 1, 1], [], []>} : vector<256x8xf32>, vector<8x256xf32>, vector<256x256xf32> -> vector<256x256xf32>
    %c0_9 = arith.constant 0 : index
    %c0_10 = arith.constant 0 : index
    %9 = vector.load %arg4[%c0_9, %c0_10] : memref<256x256xf32, #tpu.memory_space<vmem>>, vector<256x256xf32>
    %10 = arith.mulf %5, %8 : vector<256x256xf32>
    %11 = arith.addf %9, %10 : vector<256x256xf32>
    %c0_11 = arith.constant 0 : index
    %c0_12 = arith.constant 0 : index
    %12 = vector.load %arg3[%c0_11, %c0_12] : memref<16x256xf32, #tpu.memory_space<vmem>>, vector<16x256xf32>
    %c0_13 = arith.constant 0 : index
    %c0_14 = arith.constant 0 : index
    %13 = vector.load %arg10[%c0_13, %c0_14] : memref<16x256xf32, #tpu.memory_space<vmem>>, vector<16x256xf32>
    %cst_15 = arith.constant dense<0.000000e+00> : vector<16x256xf32>
    %14 = tpu.matmul %12, %11, %cst_15 {dimension_numbers = #tpu.dot_dimension_numbers<[1], [0], [0], [1], [0, 0, 1, 1], [], []>} : vector<16x256xf32>, vector<256x256xf32>, vector<16x256xf32> -> vector<16x256xf32>
    %15 = arith.addf %13, %14 : vector<16x256xf32>
    %c0_16 = arith.constant 0 : index
    %c0_17 = arith.constant 0 : index
    %16 = vector.load %arg10[%c0_16, %c0_17] : memref<16x256xf32, #tpu.memory_space<vmem>>, vector<16x256xf32>
    tpu.vector_store %arg10[%c0_16, %c0_17], %15 {strides = array<i32>} : memref<16x256xf32, #tpu.memory_space<vmem>>, vector<16x256xf32>,
    %c0_i32_18 = arith.constant 0 : i32
    %17 = arith.cmpi eq, %arg2, %c0_i32_18 : i32
    %18 = arith.extui %17 : i1 to i32
    %c0_i32_19 = arith.constant 0 : i32
    %19 = arith.cmpi ne, %18, %c0_i32_19 : i32
    scf.if %19 {
      %c0_20 = arith.constant 0 : index
      %c0_21 = arith.constant 0 : index
      %20 = vector.load %arg10[%c0_20, %c0_21] : memref<16x256xf32, #tpu.memory_space<vmem>>, vector<16x256xf32>
      %c0_22 = arith.constant 0 : index
      %c0_23 = arith.constant 0 : index
      %21 = vector.load %arg9[%c0_22, %c0_23] : memref<16x256xf32, #tpu.memory_space<vmem>>, vector<16x256xf32>
      tpu.vector_store %arg9[%c0_22, %c0_23], %20 {strides = array<i32>} : memref<16x256xf32, #tpu.memory_space<vmem>>, vector<16x256xf32>,
    } else {
    }
    return
  }
  func.func @transform_0(%arg0: i32, %arg1: i32, %arg2: i32) -> (i32, i32) {
    %c0_i32 = arith.constant 0 : i32
    return %arg0, %arg2 : i32, i32
  }
  func.func @transform_1(%arg0: i32, %arg1: i32, %arg2: i32) -> (i32, i32) {
    %c0_i32 = arith.constant 0 : i32
    return %arg2, %arg1 : i32, i32
  }
  func.func @transform_2(%arg0: i32, %arg1: i32, %arg2: i32) -> (i32, i32) {
    %c0_i32 = arith.constant 0 : i32
    %c0_i32_0 = arith.constant 0 : i32
    return %arg2, %c0_i32 : i32, i32
  }
  func.func @transform_3(%arg0: i32, %arg1: i32, %arg2: i32) -> (i32, i32) {
    %c0_i32 = arith.constant 0 : i32
    %c0_i32_0 = arith.constant 0 : i32
    return %c0_i32, %arg1 : i32, i32
  }
  func.func @transform_4(%arg0: i32, %arg1: i32, %arg2: i32) -> (i32, i32) {
    %c0_i32 = arith.constant 0 : i32
    %c0_i32_0 = arith.constant 0 : i32
    return %arg2, %c0_i32 : i32, i32
  }
  func.func @transform_5(%arg0: i32, %arg1: i32, %arg2: i32) -> (i32, i32) {
    %c0_i32 = arith.constant 0 : i32
    %c0_i32_0 = arith.constant 0 : i32
    return %c0_i32, %arg1 : i32, i32
  }
  func.func @transform_6(%arg0: i32, %arg1: i32, %arg2: i32) -> (i32, i32) {
    %c0_i32 = arith.constant 0 : i32
    return %arg0, %arg1 : i32, i32
  }
}

</mosaic_0001>

<bundles_post_ra>
// kernel: lycoris_linear_forward.1
= control target key start
LH: loop header
LB: loop body
LE: loop exit
PB: predicated region body
PF: predicated region fallthrough
CT: control target
= control target key end

     0   :  { %vm66_vm0 = vcmask 64512   ;;  %v1211_v3 = vmov 0.0   ;;  %s1981_s0 = inlined_call_operand.vmem [shape: f32[16,256], index: 0, kind: input, shape index: {}]   ;;  %s1982_s1 = inlined_call_operand.vmem [shape: f32[256,256], index: 1, kind: input, shape index: {}]   ;;  %s1983_s2 = inlined_call_operand.vmem [shape: f32[256,8], index: 2, kind: input, shape index: {}]   ;;  %s1984_s3 = inlined_call_operand.vmem [shape: f32[8,256], index: 3, kind: input, shape index: {}]   ;;  %s1985_s4 = inlined_call_operand.vmem [shape: f32[256,8], index: 4, kind: input, shape index: {}]   ;;  %s1986_s5 = inlined_call_operand.vmem [shape: f32[8,256], index: 5, kind: input, shape index: {}]   ;;  %s1987_s6 = inlined_call_operand.hbm [shape: f32[16,256], index: 6, kind: output, shape index: {}]  }
   0x1   :  { %v65_v0 = vld [vmem:[%s1984_s3 + $0x8] sm:$0xff]  ;;  %v64_v1 = vld [vmem:[%s1984_s3] sm:$0xff]  ;;  %v63_v2 = vld [vmem:[%s1983_s2 + $0xf8] sm:$0xff]  ;;  %413 = vmatprep.mubr.f32.mxu1 %v1211_v3  ;;  %227 = vmatprep.mubr.f32.mxu0 %v1211_v3 }
   0x2   :  { %1183 = vmatprep.subr.mxu1 %v65_v0  ;;  %v453_v4 = vld [vmem:[%s1986_s5 + $0x8] sm:$0xff]  ;;  %193 = vmatprep.subr.mxu0 %v65_v0  ;;  %v452_v5 = vld [vmem:[%s1986_s5] sm:$0xff]  ;;  %v34_v10 = vld [vmem:[%s1983_s2 + $0x10] sm:$0xff] }
   0x3   :  { %1184 = vmatpush1.msra.mxu1 %v64_v1  ;;  %v32_v6 = vld [vmem:[%s1983_s2] sm:$0xff]  ;;  %194 = vmatpush1.msra.mxu0 %v64_v1  ;;  %v33_v8 = vld [vmem:[%s1983_s2 + $0x8] sm:$0xff]  ;;  %v422_v11 = vld [vmem:[%s1985_s4 + $0x10] sm:$0xff] }
   0x4   :  { %1150 = vmatmul.mubr.msk.f32.vlgmr.msra.gmra.mxu1 %vm66_vm0, %v63_v2  ;;  %580 = vmatprep.subr.mxu1 %v453_v4  ;;  %v420_v7 = vld [vmem:[%s1985_s4] sm:$0xff]  ;;  %v421_v9 = vld [vmem:[%s1985_s4 + $0x8] sm:$0xff]  ;;  %v35_v12 = vld [vmem:[%s1983_s2 + $0x18] sm:$0xff] }
   0x5   :  { %581 = vmatpush1.msra.mxu1 %v452_v5  ;;  %614 = vmatprep.mubr.f32.mxu1 %v1211_v3  ;;  %v423_v13 = vld [vmem:[%s1985_s4 + $0x18] sm:$0xff]  ;;  %v36_v14 = vld [vmem:[%s1983_s2 + $0x20] sm:$0xff] }
   0x6   :  { %1119 = vmatmul.mubr.msk.f32.vlgmr.msra.gmra.mxu0 %vm66_vm0, %v32_v6  ;;  %v424_v15 = vld [vmem:[%s1985_s4 + $0x20] sm:$0xff] }
   0x7   :  { %233 = vmatprep.mubr.f32.mxu0 %v1211_v3 }
   0x8   :  { %1151 = vmatmul.mubr.msk.f32.vlgmr.msra.gmra.mxu1 %vm66_vm0, %v420_v7 }
   0x9   :  { %620 = vmatprep.mubr.f32.mxu1 %v1211_v3 }
   0xa   :  { %1120 = vmatmul.mubr.msk.f32.gmra.mxu0 %vm66_vm0, %v33_v8 }
   0xb   :  { %239 = vmatprep.mubr.f32.mxu0 %v1211_v3 }
   0xc   :  { %1152 = vmatmul.mubr.msk.f32.gmra.mxu1 %vm66_vm0, %v421_v9 }
   0xd   :  { %626 = vmatprep.mubr.f32.mxu1 %v1211_v3 }
   0xe   :  { %1121 = vmatmul.mubr.msk.f32.gmra.mxu0 %vm66_vm0, %v34_v10 }
   0xf   :  { %245 = vmatprep.mubr.f32.mxu0 %v1211_v3 }
  0x10   :  { %1153 = vmatmul.mubr.msk.f32.gmra.mxu1 %vm66_vm0, %v422_v11 }
  0x11   :  { %632 = vmatprep.mubr.f32.mxu1 %v1211_v3 }
  0x12   :  { %1122 = vmatmul.mubr.msk.f32.gmra.mxu0 %vm66_vm0, %v35_v12 }
  0x13   :  { %251 = vmatprep.mubr.f32.mxu0 %v1211_v3 }
  0x14   :  { %1154 = vmatmul.mubr.msk.f32.gmra.mxu1 %vm66_vm0, %v423_v13 }
  0x15   :  { %638 = vmatprep.mubr.f32.mxu1 %v1211_v3 }
  0x16   :  { %1123 = vmatmul.mubr.msk.f32.gmra.mxu0 %vm66_vm0, %v36_v14 }
  0x17   :  { %11 = vsyncpa [#allocation4], 0  ;;  %257 = vmatprep.mubr.f32.mxu0 %v1211_v3  ;;  %v37_v16 = vld [vmem:[%s1983_s2 + $0x28] sm:$0xff]  ;;  %v38_v18 = vld [vmem:[%s1983_s2 + $0x30] sm:$0xff]  ;;  %s1212_s22 = smov [#allocation3]  }
  0x18   :  { %1155 = vmatmul.mubr.msk.f32.gmra.mxu1 %vm66_vm0, %v424_v15  ;;  %v425_v17 = vld [vmem:[%s1985_s4 + $0x28] sm:$0xff]  ;;  %v426_v19 = vld [vmem:[%s1985_s4 + $0x30] sm:$0xff]  ;;  %v39_v20 = vld [vmem:[%s1983_s2 + $0x38] sm:$0xff]  ;;  %s1108_s23 = sshll.u32 %s1212_s22, 4  ;;  %s1109_s23 = int_to_ptr.vmem [resolvable:$true] %s1108_s23 }
  0x19   :  { %644 = vmatprep.mubr.f32.mxu1 %v1211_v3  ;;  %v427_v21 = vld [vmem:[%s1985_s4 + $0x38] sm:$0xff]  ;;  %v40_v22 = vld [vmem:[%s1983_s2 + $0x40] sm:$0xff]  ;;  %v41_v24 = vld [vmem:[%s1983_s2 + $0x48] sm:$0xff]  ;;  %s1189_s24 = scalar_lea.vmem %s1109_s23, 512  ;;  %p1194_p1 = scmp.lt.s32.totalorder %s1109_s23, %s1109_s23 }
  0x1a   :  { %1124 = vmatmul.mubr.msk.f32.gmra.mxu0 %vm66_vm0, %v37_v16  ;;  %v428_v23 = vld [vmem:[%s1985_s4 + $0x40] sm:$0xff]  ;;  %v429_v25 = vld [vmem:[%s1985_s4 + $0x48] sm:$0xff]  ;;  %v42_v26 = vld [vmem:[%s1983_s2 + $0x50] sm:$0xff]  ;;  %p1190_p0 = scmp.ne.s32.totalorder %s1109_s23, %s1189_s24  ;;  %p1195_p2 = scmp.lt.s32.totalorder %s1189_s24, %s1189_s24 }
  0x1b   :  { %263 = vmatprep.mubr.f32.mxu0 %v1211_v3  ;;  %v430_v27 = vld [vmem:[%s1985_s4 + $0x50] sm:$0xff]  ;;  %v43_v28 = vld [vmem:[%s1983_s2 + $0x58] sm:$0xff]  ;;  %v44_v30 = vld [vmem:[%s1983_s2 + $0x60] sm:$0xff] }
  0x1c   :  { %1156 = vmatmul.mubr.msk.f32.gmra.mxu1 %vm66_vm0, %v425_v17  ;;  %v431_v29 = vld [vmem:[%s1985_s4 + $0x58] sm:$0xff]  ;;  %v432_v31 = vld [vmem:[%s1985_s4 + $0x60] sm:$0xff]  ;;  %v45_v32 = vld [vmem:[%s1983_s2 + $0x68] sm:$0xff]  ;;  %p1196_p3 = por %p1195_p2, %p1194_p1 }
  0x1d   :  { %650 = vmatprep.mubr.f32.mxu1 %v1211_v3  ;;  %v433_v33 = vld [vmem:[%s1985_s4 + $0x68] sm:$0xff]  ;;  %v46_v34 = vld [vmem:[%s1983_s2 + $0x70] sm:$0xff]  ;;  %v47_v36 = vld [vmem:[%s1983_s2 + $0x78] sm:$0xff] }
  0x1e   :  { %1125 = vmatmul.mubr.msk.f32.gmra.mxu0 %vm66_vm0, %v38_v18  ;;  %v434_v35 = vld [vmem:[%s1985_s4 + $0x70] sm:$0xff]  ;;  %v435_v37 = vld [vmem:[%s1985_s4 + $0x78] sm:$0xff]  ;;  %v48_v38 = vld [vmem:[%s1983_s2 + $0x80] sm:$0xff]  ;;  %p1197_p4 = pnand %p1196_p3, %p1190_p0 }
  0x1f   :  { %269 = vmatprep.mubr.f32.mxu0 %v1211_v3  ;;  %v436_v39 = vld [vmem:[%s1985_s4 + $0x80] sm:$0xff]  ;;  %v49_v40 = vld [vmem:[%s1983_s2 + $0x88] sm:$0xff]  ;;  %v50_v42 = vld [vmem:[%s1983_s2 + $0x90] sm:$0xff] }
  0x20   :  { %1157 = vmatmul.mubr.msk.f32.gmra.mxu1 %vm66_vm0, %v426_v19  ;;  %v437_v41 = vld [vmem:[%s1985_s4 + $0x88] sm:$0xff]  ;;  %v438_v43 = vld [vmem:[%s1985_s4 + $0x90] sm:$0xff]  ;;  %v51_v44 = vld [vmem:[%s1983_s2 + $0x98] sm:$0xff] }
  0x21   :  { %656 = vmatprep.mubr.f32.mxu1 %v1211_v3  ;;  %v439_v45 = vld [vmem:[%s1985_s4 + $0x98] sm:$0xff]  ;;  %v52_v46 = vld [vmem:[%s1983_s2 + $0xa0] sm:$0xff]  ;;  %v53_v48 = vld [vmem:[%s1983_s2 + $0xa8] sm:$0xff] }
  0x22   :  { %1126 = vmatmul.mubr.msk.f32.gmra.mxu0 %vm66_vm0, %v39_v20  ;;  %v440_v47 = vld [vmem:[%s1985_s4 + $0xa0] sm:$0xff]  ;;  %v441_v49 = vld [vmem:[%s1985_s4 + $0xa8] sm:$0xff]  ;;  %v54_v50 = vld [vmem:[%s1983_s2 + $0xb0] sm:$0xff] }
  0x23   :  { %275 = vmatprep.mubr.f32.mxu0 %v1211_v3  ;;  %v442_v51 = vld [vmem:[%s1985_s4 + $0xb0] sm:$0xff]  ;;  %v55_v52 = vld [vmem:[%s1983_s2 + $0xb8] sm:$0xff]  ;;  %v56_v54 = vld [vmem:[%s1983_s2 + $0xc0] sm:$0xff] }
  0x24   :  { %1158 = vmatmul.mubr.msk.f32.gmra.mxu1 %vm66_vm0, %v427_v21  ;;  %v443_v53 = vld [vmem:[%s1985_s4 + $0xb8] sm:$0xff]  ;;  %v444_v55 = vld [vmem:[%s1985_s4 + $0xc0] sm:$0xff]  ;;  %v57_v56 = vld [vmem:[%s1983_s2 + $0xc8] sm:$0xff] }
  0x25   :  { %662 = vmatprep.mubr.f32.mxu1 %v1211_v3  ;;  %v445_v57 = vld [vmem:[%s1985_s4 + $0xc8] sm:$0xff]  ;;  %v58_v58 = vld [vmem:[%s1983_s2 + $0xd0] sm:$0xff]  ;;  %v59_v60 = vld [vmem:[%s1983_s2 + $0xd8] sm:$0xff] }
  0x26   :  { %1127 = vmatmul.mubr.msk.f32.gmra.mxu0 %vm66_vm0, %v40_v22  ;;  %v446_v59 = vld [vmem:[%s1985_s4 + $0xd0] sm:$0xff]  ;;  %v447_v61 = vld [vmem:[%s1985_s4 + $0xd8] sm:$0xff]  ;;  %v60_v62 = vld [vmem:[%s1983_s2 + $0xe0] sm:$0xff] }
  0x27   :  { %281 = vmatprep.mubr.f32.mxu0 %v1211_v3  ;;  %v448_v63 = vld [vmem:[%s1985_s4 + $0xe0] sm:$0xff]  ;;  %v61_v0 = vld [vmem:[%s1983_s2 + $0xe8] sm:$0xff]  ;;  %v62_v2 = vld [vmem:[%s1983_s2 + $0xf0] sm:$0xff] }
  0x28   :  { %1159 = vmatmul.mubr.msk.f32.gmra.mxu1 %vm66_vm0, %v428_v23  ;;  %v449_v1 = vld [vmem:[%s1985_s4 + $0xe8] sm:$0xff]  ;;  %v450_v4 = vld [vmem:[%s1985_s4 + $0xf0] sm:$0xff]  ;;  %v451_v5 = vld [vmem:[%s1985_s4 + $0xf8] sm:$0xff] }
  0x29   :  { %668 = vmatprep.mubr.f32.mxu1 %v1211_v3 }
  0x2a   :  { %1128 = vmatmul.mubr.msk.f32.gmra.mxu0 %vm66_vm0, %v41_v24 }
  0x2b   :  { %287 = vmatprep.mubr.f32.mxu0 %v1211_v3 }
  0x2c   :  { %1160 = vmatmul.mubr.msk.f32.gmra.mxu1 %vm66_vm0, %v429_v25 }
  0x2d   :  { %674 = vmatprep.mubr.f32.mxu1 %v1211_v3 }
  0x2e   :  { %1129 = vmatmul.mubr.msk.f32.gmra.mxu0 %vm66_vm0, %v42_v26 }
  0x2f   :  { %293 = vmatprep.mubr.f32.mxu0 %v1211_v3 }
  0x30   :  { %1161 = vmatmul.mubr.msk.f32.gmra.mxu1 %vm66_vm0, %v430_v27 }
  0x31   :  { %680 = vmatprep.mubr.f32.mxu1 %v1211_v3 }
  0x32   :  { %1130 = vmatmul.mubr.msk.f32.gmra.mxu0 %vm66_vm0, %v43_v28 }
  0x33   :  { %299 = vmatprep.mubr.f32.mxu0 %v1211_v3 }
  0x34   :  { %1162 = vmatmul.mubr.msk.f32.gmra.mxu1 %vm66_vm0, %v431_v29 }
  0x35   :  { %686 = vmatprep.mubr.f32.mxu1 %v1211_v3 }
  0x36   :  { %1131 = vmatmul.mubr.msk.f32.gmra.mxu0 %vm66_vm0, %v44_v30 }
  0x37   :  { %305 = vmatprep.mubr.f32.mxu0 %v1211_v3 }
  0x38   :  { %1163 = vmatmul.mubr.msk.f32.gmra.mxu1 %vm66_vm0, %v432_v31 }
  0x39   :  { %692 = vmatprep.mubr.f32.mxu1 %v1211_v3 }
  0x3a   :  { %1132 = vmatmul.mubr.msk.f32.gmra.mxu0 %vm66_vm0, %v45_v32 }
  0x3b   :  { %311 = vmatprep.mubr.f32.mxu0 %v1211_v3 }
  0x3c   :  { %1164 = vmatmul.mubr.msk.f32.gmra.mxu1 %vm66_vm0, %v433_v33 }
  0x3d   :  { %698 = vmatprep.mubr.f32.mxu1 %v1211_v3 }
  0x3e   :  { %1133 = vmatmul.mubr.msk.f32.gmra.mxu0 %vm66_vm0, %v46_v34 }
  0x3f   :  { %317 = vmatprep.mubr.f32.mxu0 %v1211_v3 }
  0x40   :  { %1165 = vmatmul.mubr.msk.f32.gmra.mxu1 %vm66_vm0, %v434_v35 }
  0x41   :  { %704 = vmatprep.mubr.f32.mxu1 %v1211_v3 }
  0x42   :  { %1134 = vmatmul.mubr.msk.f32.gmra.mxu0 %vm66_vm0, %v47_v36 }
  0x43   :  { %323 = vmatprep.mubr.f32.mxu0 %v1211_v3 }
  0x44   :  { %1166 = vmatmul.mubr.msk.f32.gmra.mxu1 %vm66_vm0, %v435_v37 }
  0x45   :  { %710 = vmatprep.mubr.f32.mxu1 %v1211_v3 }
  0x46   :  { %1135 = vmatmul.mubr.msk.f32.gmra.mxu0 %vm66_vm0, %v48_v38 }
  0x47   :  { %329 = vmatprep.mubr.f32.mxu0 %v1211_v3 }
  0x48   :  { %1167 = vmatmul.mubr.msk.f32.gmra.mxu1 %vm66_vm0, %v436_v39 }
  0x49   :  { %716 = vmatprep.mubr.f32.mxu1 %v1211_v3 }
  0x4a   :  { %1136 = vmatmul.mubr.msk.f32.gmra.mxu0 %vm66_vm0, %v49_v40 }
  0x4b   :  { %335 = vmatprep.mubr.f32.mxu0 %v1211_v3 }
  0x4c   :  { %1168 = vmatmul.mubr.msk.f32.gmra.mxu1 %vm66_vm0, %v437_v41 }
  0x4d   :  { %722 = vmatprep.mubr.f32.mxu1 %v1211_v3 }
  0x4e   :  { %1137 = vmatmul.mubr.msk.f32.gmra.mxu0 %vm66_vm0, %v50_v42 }
  0x4f   :  { %341 = vmatprep.mubr.f32.mxu0 %v1211_v3 }
  0x50   :  { %1169 = vmatmul.mubr.msk.f32.gmra.mxu1 %vm66_vm0, %v438_v43 }
  0x51   :  { %728 = vmatprep.mubr.f32.mxu1 %v1211_v3 }
  0x52   :  { %1138 = vmatmul.mubr.msk.f32.gmra.mxu0 %vm66_vm0, %v51_v44 }
  0x53   :  { %347 = vmatprep.mubr.f32.mxu0 %v1211_v3 }
  0x54   :  { %1170 = vmatmul.mubr.msk.f32.gmra.mxu1 %vm66_vm0, %v439_v45 }
  0x55   :  { %734 = vmatprep.mubr.f32.mxu1 %v1211_v3 }
  0x56   :  { %1139 = vmatmul.mubr.msk.f32.gmra.mxu0 %vm66_vm0, %v52_v46 }
  0x57   :  { %353 = vmatprep.mubr.f32.mxu0 %v1211_v3 }
  0x58   :  { %1171 = vmatmul.mubr.msk.f32.gmra.mxu1 %vm66_vm0, %v440_v47 }
  0x59   :  { %740 = vmatprep.mubr.f32.mxu1 %v1211_v3 }
  0x5a   :  { %1140 = vmatmul.mubr.msk.f32.gmra.mxu0 %vm66_vm0, %v53_v48 }
  0x5b   :  { %359 = vmatprep.mubr.f32.mxu0 %v1211_v3 }
  0x5c   :  { %1172 = vmatmul.mubr.msk.f32.gmra.mxu1 %vm66_vm0, %v441_v49 }
  0x5d   :  { %746 = vmatprep.mubr.f32.mxu1 %v1211_v3 }
  0x5e   :  { %1141 = vmatmul.mubr.msk.f32.gmra.mxu0 %vm66_vm0, %v54_v50 }
  0x5f   :  { %365 = vmatprep.mubr.f32.mxu0 %v1211_v3 }
  0x60   :  { %1173 = vmatmul.mubr.msk.f32.gmra.mxu1 %vm66_vm0, %v442_v51 }
  0x61   :  { %752 = vmatprep.mubr.f32.mxu1 %v1211_v3 }
  0x62   :  { %1142 = vmatmul.mubr.msk.f32.gmra.mxu0 %vm66_vm0, %v55_v52  ;;  %v1000_v52 = vld [vmem:[%s1981_s0 + $0x8] sm:$0xff] }
  0x63   :  { %371 = vmatprep.mubr.f32.mxu0 %v1211_v3 }
  0x64   :  { %1174 = vmatmul.mubr.msk.f32.gmra.mxu1 %vm66_vm0, %v443_v53 }
  0x65   :  { %758 = vmatprep.mubr.f32.mxu1 %v1211_v3 }
  0x66   :  { %1143 = vmatmul.mubr.msk.f32.gmra.mxu0 %vm66_vm0, %v56_v54 }
  0x67   :  { %377 = vmatprep.mubr.f32.mxu0 %v1211_v3 }
  0x68   :  { %1175 = vmatmul.mubr.msk.f32.gmra.mxu1 %vm66_vm0, %v444_v55 }
  0x69   :  { %764 = vmatprep.mubr.f32.mxu1 %v1211_v3 }
  0x6a   :  { %1144 = vmatmul.mubr.msk.f32.gmra.mxu0 %vm66_vm0, %v57_v56 }
  0x6b   :  { %383 = vmatprep.mubr.f32.mxu0 %v1211_v3 }
  0x6c   :  { %1176 = vmatmul.mubr.msk.f32.gmra.mxu1 %vm66_vm0, %v445_v57 }
  0x6d   :  { %770 = vmatprep.mubr.f32.mxu1 %v1211_v3 }
  0x6e   :  { %1145 = vmatmul.mubr.msk.f32.gmra.mxu0 %vm66_vm0, %v58_v58 }
  0x6f   :  { %389 = vmatprep.mubr.f32.mxu0 %v1211_v3 }
  0x70   :  { %1177 = vmatmul.mubr.msk.f32.gmra.mxu1 %vm66_vm0, %v446_v59 }
  0x71   :  { %776 = vmatprep.mubr.f32.mxu1 %v1211_v3 }
  0x72   :  { %1146 = vmatmul.mubr.msk.f32.gmra.mxu0 %vm66_vm0, %v59_v60 }
  0x73   :  { %395 = vmatprep.mubr.f32.mxu0 %v1211_v3 }
  0x74   :  { %1178 = vmatmul.mubr.msk.f32.gmra.mxu1 %vm66_vm0, %v447_v61 }
  0x75   :  { %782 = vmatprep.mubr.f32.mxu1 %v1211_v3 }
  0x76   :  { %1147 = vmatmul.mubr.msk.f32.gmra.mxu0 %vm66_vm0, %v60_v62 }
  0x77   :  { %401 = vmatprep.mubr.f32.mxu0 %v1211_v3 }
  0x78   :  { %1179 = vmatmul.mubr.msk.f32.gmra.mxu1 %vm66_vm0, %v448_v63 }
  0x79   :  { %788 = vmatprep.mubr.f32.mxu1 %v1211_v3 }
  0x7a   :  { %1148 = vmatmul.mubr.msk.f32.gmra.mxu0 %vm66_vm0, %v61_v0 }
  0x7b   :  { %407 = vmatprep.mubr.f32.mxu0 %v1211_v3 }
  0x7c   :  { %1180 = vmatmul.mubr.msk.f32.gmra.mxu1 %vm66_vm0, %v449_v1 }
  0x7d   :  { %794 = vmatprep.mubr.f32.mxu1 %v1211_v3 }
  0x7e   :  { %1149 = vmatmul.mubr.msk.f32.gmra.mxu0 %vm66_vm0, %v62_v2 }
  0x7f   :  { %1071 = vmatprep.mubr.f32.mxu0 %v1000_v52  ;;  %v836_v52 = vld [vmem:[%s1982_s1 + $0xe8] sm:$0xff] }
  0x80   :  { %1181 = vmatmul.mubr.msk.f32.gmra.mxu1 %vm66_vm0, %v450_v4 }
  0x81   :  { %800 = vmatprep.mubr.f32.mxu1 %v1211_v3 }
  0x84   :  { %1182 = vmatmul.mubr.msk.f32.gmra.mxu1 %vm66_vm0, %v451_v5 }
  0xc4   :  { %v1582_v6 = vpop.f32.mrf.mxu1 }
  0xc5   :  { %1988 = vst [vmem:[#allocation6_spill] sm:$0xff] %v1582_v6 }
  0xc6   :  { %v1584_v7 = vpop.f32.mrf.mxu1  ;;  %v229_v8 = vpop.f32.mrf.mxu0 }
  0xc7   :  { %1989 = vst [vmem:[#allocation7_spill] sm:$0xff] %v1584_v7 }
  0xc8   :  { %v616_v9 = vpop.f32.mrf.mxu1  ;;  %v231_v11 = vpop.f32.mrf.mxu0 }
  0xc9   :  { %v1586_v10 = vmul.f32 %v616_v9, %v229_v8 }
  0xca   :  { %v618_v12 = vpop.f32.mrf.mxu1  ;;  %v235_v14 = vpop.f32.mrf.mxu0 }
  0xcb   :  { %1990 = vst [vmem:[#allocation8_spill] sm:$0xff] %v1586_v10  ;;  %v1588_v13 = vmul.f32 %v618_v12, %v231_v11 }
  0xcc   :  { %v622_v3 = vpop.f32.mrf.mxu1  ;;  %v237_v16 = vpop.f32.mrf.mxu0 }
  0xcd   :  { %1991 = vst [vmem:[#allocation9_spill] sm:$0xff] %v1588_v13  ;;  %v1590_v15 = vmul.f32 %v622_v3, %v235_v14 }
  0xce   :  { %v624_v17 = vpop.f32.mrf.mxu1  ;;  %v241_v19 = vpop.f32.mrf.mxu0 }
  0xcf   :  { %v1592_v18 = vmul.f32 %v624_v17, %v237_v16 }
  0xd0   :  { %v628_v20 = vpop.f32.mrf.mxu1  ;;  %v243_v22 = vpop.f32.mrf.mxu0 }
  0xd1   :  { %v1594_v21 = vmul.f32 %v628_v20, %v241_v19 }
  0xd2   :  { %v630_v23 = vpop.f32.mrf.mxu1  ;;  %v247_v25 = vpop.f32.mrf.mxu0 }
  0xd3   :  { %v1596_v24 = vmul.f32 %v630_v23, %v243_v22 }
  0xd4   :  { %v634_v26 = vpop.f32.mrf.mxu1  ;;  %v249_v28 = vpop.f32.mrf.mxu0 }
  0xd5   :  { %v1598_v27 = vmul.f32 %v634_v26, %v247_v25 }
  0xd6   :  { %v636_v29 = vpop.f32.mrf.mxu1  ;;  %v253_v31 = vpop.f32.mrf.mxu0 }
  0xd7   :  { %v1600_v30 = vmul.f32 %v636_v29, %v249_v28  ;;  %v838_v28 = vld [vmem:[%s1982_s1 + $0xf8] sm:$0xff] }
  0xd8   :  { %v640_v32 = vpop.f32.mrf.mxu1  ;;  %v255_v34 = vpop.f32.mrf.mxu0 }
  0xd9   :  { %v1602_v33 = vmul.f32 %v640_v32, %v253_v31  ;;  %v837_v31 = vld [vmem:[%s1982_s1 + $0xf0] sm:$0xff] }
  0xda   :  { %v642_v35 = vpop.f32.mrf.mxu1  ;;  %v1606_v37 = vpop.f32.mrf.mxu0 }
  0xdb   :  { %v1604_v36 = vmul.f32 %v642_v35, %v255_v34 }
  0xdc   :  { %v1608_v38 = vpop.f32.mrf.mxu1  ;;  %v1610_v39 = vpop.f32.mrf.mxu0 }
  0xde   :  { %v1612_v40 = vpop.f32.mrf.mxu1  ;;  %v1614_v41 = vpop.f32.mrf.mxu0 }
  0xe0   :  { %v1616_v42 = vpop.f32.mrf.mxu1  ;;  %v1618_v43 = vpop.f32.mrf.mxu0 }
  0xe2   :  { %v1620_v44 = vpop.f32.mrf.mxu1  ;;  %v1622_v45 = vpop.f32.mrf.mxu0 }
  0xe4   :  { %v1624_v46 = vpop.f32.mrf.mxu1  ;;  %v1626_v47 = vpop.f32.mrf.mxu0 }
  0xe6   :  { %v1628_v48 = vpop.f32.mrf.mxu1  ;;  %v1630_v49 = vpop.f32.mrf.mxu0 }
  0xe8   :  { %v1632_v50 = vpop.f32.mrf.mxu1  ;;  %v1634_v51 = vpop.f32.mrf.mxu0 }
  0xea   :  { %v1639_v53 = vpop.f32.mrf.mxu1  ;;  %v1641_v54 = vpop.f32.mrf.mxu0 }
  0xec   :  { %v1643_v55 = vpop.f32.mrf.mxu1  ;;  %v1645_v56 = vpop.f32.mrf.mxu0 }
  0xee   :  { %v1647_v57 = vpop.f32.mrf.mxu1  ;;  %v1649_v58 = vpop.f32.mrf.mxu0 }
  0xf0   :  { %v1651_v59 = vpop.f32.mrf.mxu1  ;;  %v291_v60 = vpop.f32.mrf.mxu0 }
  0xf2   :  { %v678_v61 = vpop.f32.mrf.mxu1  ;;  %v295_v62 = vpop.f32.mrf.mxu0 }
  0xf4   :  { %v682_v63 = vpop.f32.mrf.mxu1  ;;  %v297_v0 = vpop.f32.mrf.mxu0 }
  0xf6   :  { %v684_v1 = vpop.f32.mrf.mxu1  ;;  %v301_v2 = vpop.f32.mrf.mxu0 }
  0xf8   :  { %v688_v4 = vpop.f32.mrf.mxu1  ;;  %v303_v5 = vpop.f32.mrf.mxu0 }
  0xfa   :  { %v690_v8 = vpop.f32.mrf.mxu1  ;;  %v307_v9 = vpop.f32.mrf.mxu0 }
  0xfc   :  { %v694_v11 = vpop.f32.mrf.mxu1  ;;  %v309_v12 = vpop.f32.mrf.mxu0 }
  0xfe   :  { %v696_v14 = vpop.f32.mrf.mxu1  ;;  %v313_v3 = vpop.f32.mrf.mxu0 }
  0xff   :  { %v898_v6 = vmul.f32 %v696_v14, %v309_v12  ;;  %v833_v12 = vld [vmem:[%s1982_s1 + $0xd0] sm:$0xff] }
 0x100   :  { %v700_v16 = vpop.f32.mrf.mxu1  ;;  %v315_v17 = vpop.f32.mrf.mxu0 }
 0x101   :  { %v899_v35 = vmul.f32 %v700_v16, %v313_v3 }
 0x102   :  { %v702_v19 = vpop.f32.mrf.mxu1  ;;  %v319_v20 = vpop.f32.mrf.mxu0 }
 0x103   :  { %v900_v29 = vmul.f32 %v702_v19, %v315_v17  ;;  %v897_v19 = vmul.f32 %v694_v11, %v307_v9  ;;  %v832_v9 = vld [vmem:[%s1982_s1 + $0xc8] sm:$0xff] }
 0x104   :  { %v706_v22 = vpop.f32.mrf.mxu1  ;;  %v321_v23 = vpop.f32.mrf.mxu0 }
 0x105   :  { %v901_v25 = vmul.f32 %v706_v22, %v319_v20  ;;  %v835_v20 = vld [vmem:[%s1982_s1 + $0xe0] sm:$0xff]  ;;  %v964_v14 = vadd.f32 %v900_v29, %v836_v52 }
 0x106   :  { %v708_v26 = vpop.f32.mrf.mxu1  ;;  %v325_v34 = vpop.f32.mrf.mxu0  ;;  %v963_v11 = vadd.f32 %v899_v35, %v835_v20  ;;  %v892_v35 = vmul.f32 %v678_v61, %v291_v60  ;;  %v890_v60 = vmul.f32 %v1647_v57, %v1645_v56  ;;  %v827_v61 = vld [vmem:[%s1982_s1 + $0xa0] sm:$0xff]  ;;  %v888_v56 = vmul.f32 %v1639_v53, %v1634_v51  ;;  %v825_v57 = vld [vmem:[%s1982_s1 + $0x90] sm:$0xff] }
 0x107   :  { %v902_v32 = vmul.f32 %v708_v26, %v321_v23  ;;  %v834_v23 = vld [vmem:[%s1982_s1 + $0xd8] sm:$0xff]  ;;  %v965_v3 = vadd.f32 %v901_v25, %v837_v31  ;;  %v896_v26 = vmul.f32 %v690_v8, %v303_v5  ;;  %v894_v25 = vmul.f32 %v684_v1, %v297_v0  ;;  %v831_v5 = vld [vmem:[%s1982_s1 + $0xc0] sm:$0xff]  ;;  %v829_v0 = vld [vmem:[%s1982_s1 + $0xb0] sm:$0xff] }
 0x108   :  { %v712_v7 = vpop.f32.mrf.mxu1  ;;  %v327_v17 = vpop.f32.mrf.mxu0  ;;  %v962_v8 = vadd.f32 %v898_v6, %v834_v23  ;;  %v886_v51 = vmul.f32 %v1628_v48, %v1626_v47  ;;  %v823_v53 = vld [vmem:[%s1982_s1 + $0x80] sm:$0xff]  ;;  %v884_v47 = vmul.f32 %v1620_v44, %v1618_v43  ;;  %v821_v48 = vld [vmem:[%s1982_s1 + $0x70] sm:$0xff]  ;;  %v882_v43 = vmul.f32 %v1612_v40, %v1610_v39 }
 0x109   :  { %v966_v22 = vadd.f32 %v902_v32, %v838_v28  ;;  %v1665_v10 = vmul.f32 %v712_v7, %v325_v34  ;;  %v895_v7 = vmul.f32 %v688_v4, %v301_v2  ;;  %v893_v34 = vmul.f32 %v682_v63, %v295_v62  ;;  %v830_v2 = vld [vmem:[%s1982_s1 + $0xb8] sm:$0xff]  ;;  %v828_v63 = vld [vmem:[%s1982_s1 + $0xa8] sm:$0xff]  ;;  %v819_v44 = vld [vmem:[%s1982_s1 + $0x60] sm:$0xff] }
 0x10a   :  { %v714_v16 = vpop.f32.mrf.mxu1  ;;  %v331_v28 = vpop.f32.mrf.mxu0  ;;  %v961_v4 = vadd.f32 %v897_v19, %v833_v12  ;;  %v960_v1 = vadd.f32 %v896_v26, %v832_v9  ;;  %v891_v62 = vmul.f32 %v1651_v59, %v1649_v58  ;;  %v958_v19 = vadd.f32 %v894_v25, %v830_v2  ;;  %v826_v59 = vld [vmem:[%s1982_s1 + $0x98] sm:$0xff]  ;;  %v817_v39 = vld [vmem:[%s1982_s1 + $0x50] sm:$0xff] }
 0x10b   :  { %1992 = vst [vmem:[#allocation10_spill] sm:$0xff] %v1665_v10  ;;  %v1673_v13 = vmul.f32 %v714_v16, %v327_v17  ;;  %1007 = vmatprep.subr.mxu0 %v966_v22  ;;  %v959_v22 = vadd.f32 %v895_v7, %v831_v5  ;;  %v889_v58 = vmul.f32 %v1643_v55, %v1641_v54  ;;  %v824_v55 = vld [vmem:[%s1982_s1 + $0x88] sm:$0xff] }
 0x10c   :  { %v718_v32 = vpop.f32.mrf.mxu1  ;;  %1008 = vmatpush1.msra.mxu0 %v965_v3  ;;  %v333_v29 = vpop.f32.mrf.mxu0  ;;  %v957_v16 = vadd.f32 %v893_v34, %v829_v0  ;;  %v956_v12 = vadd.f32 %v892_v35, %v828_v63  ;;  %v887_v54 = vmul.f32 %v1632_v50, %v1630_v49  ;;  %v955_v7 = vadd.f32 %v891_v62, %v827_v61  ;;  %v822_v50 = vld [vmem:[%s1982_s1 + $0x78] sm:$0xff] }
 0x10d   :  { %1993 = vst [vmem:[#allocation11_spill] sm:$0xff] %v1673_v13  ;;  %v1681_v31 = vmul.f32 %v718_v32, %v331_v28  ;;  %1009 = vmatprep.subr.mxu0 %v964_v14  ;;  %v885_v49 = vmul.f32 %v1624_v46, %v1622_v45  ;;  %v953_v5 = vadd.f32 %v889_v58, %v825_v57  ;;  %v820_v46 = vld [vmem:[%s1982_s1 + $0x68] sm:$0xff]  ;;  %v814_v61 = vld [vmem:[%s1982_s1 + $0x38] sm:$0xff]  ;;  %v813_v58 = vld [vmem:[%s1982_s1 + $0x30] sm:$0xff] }
 0x10e   :  { %v720_v52 = vpop.f32.mrf.mxu1  ;;  %1010 = vmatpush1.msra.mxu0 %v963_v11  ;;  %v337_v6 = vpop.f32.mrf.mxu0  ;;  %v954_v11 = vadd.f32 %v890_v60, %v826_v59  ;;  %v883_v45 = vmul.f32 %v1616_v42, %v1614_v41  ;;  %v950_v35 = vadd.f32 %v886_v51, %v822_v50  ;;  %v881_v41 = vmul.f32 %v1608_v38, %v1606_v37  ;;  %v818_v42 = vld [vmem:[%s1982_s1 + $0x58] sm:$0xff]  ;;  %v816_v37 = vld [vmem:[%s1982_s1 + $0x48] sm:$0xff] }
 0x10f   :  { %v1689_v20 = vmul.f32 %v720_v52, %v333_v29  ;;  %1011 = vmatprep.subr.mxu0 %v962_v8  ;;  %v952_v29 = vadd.f32 %v888_v56, %v824_v55  ;;  %v948_v40 = vadd.f32 %v884_v47, %v820_v46  ;;  %v944_v59 = vadd.f32 %v1604_v36, %v816_v37  ;;  %v808_v51 = vld [vmem:[%s1982_s1 + $0x8] sm:$0xff]  ;;  %v1995_v47 = vld [vmem:[#allocation8_spill] sm:$0xff] }
 0x110   :  { %v724_v17 = vpop.f32.mrf.mxu1  ;;  %1012 = vmatpush1.msra.mxu0 %v961_v4  ;;  %v339_v3 = vpop.f32.mrf.mxu0  ;;  %v951_v4 = vadd.f32 %v887_v54, %v823_v53  ;;  %v947_v38 = vadd.f32 %v883_v45, %v819_v44  ;;  %v810_v54 = vld [vmem:[%s1982_s1 + $0x18] sm:$0xff]  ;;  %v941_v55 = vadd.f32 %v1598_v27, %v813_v58  ;;  %v807_v27 = vld [vmem:[%s1982_s1] sm:$0xff] }
 0x111   :  { %v1701_v23 = vmul.f32 %v724_v17, %v337_v6  ;;  %1013 = vmatprep.subr.mxu0 %v960_v1  ;;  %v949_v1 = vadd.f32 %v885_v49, %v821_v48  ;;  %v946_v17 = vadd.f32 %v882_v43, %v818_v42  ;;  %v935_v48 = vadd.f32 %v1995_v47, %v807_v27  ;;  %v868_v47 = vld [vmem:[%s1982_s1 + $0x1e8] sm:$0xff] }
 0x112   :  { %v726_v26 = vpop.f32.mrf.mxu1  ;;  %1014 = vmatpush1.msra.mxu0 %v959_v22  ;;  %v343_v28 = vpop.f32.mrf.mxu0  ;;  %v815_v22 = vld [vmem:[%s1982_s1 + $0x40] sm:$0xff] }
 0x113   :  { %v1713_v14 = vmul.f32 %v726_v26, %v339_v3  ;;  %1015 = vmatprep.subr.mxu0 %v958_v19  ;;  %v945_v19 = vadd.f32 %v881_v41, %v817_v39  ;;  %v812_v26 = vld [vmem:[%s1982_s1 + $0x28] sm:$0xff]  ;;  %v943_v56 = vadd.f32 %v1602_v33, %v815_v22  ;;  %v809_v33 = vld [vmem:[%s1982_s1 + $0x10] sm:$0xff] }
 0x114   :  { %v730_v9 = vpop.f32.mrf.mxu1  ;;  %1016 = vmatpush1.msra.mxu0 %v957_v16  ;;  %v345_v25 = vpop.f32.mrf.mxu0  ;;  %v937_v49 = vadd.f32 %v1590_v15, %v809_v33  ;;  %v1996_v33 = vld [vmem:[#allocation6_spill] sm:$0xff] }
 0x115   :  { %v1725_v32 = vmul.f32 %v730_v9, %v343_v28  ;;  %1017 = vmatprep.subr.mxu0 %v956_v12  ;;  %v811_v12 = vld [vmem:[%s1982_s1 + $0x20] sm:$0xff]  ;;  %v942_v28 = vadd.f32 %v1600_v30, %v814_v61  ;;  %v940_v9 = vadd.f32 %v1596_v24, %v812_v26 }
 0x116   :  { %v732_v8 = vpop.f32.mrf.mxu1  ;;  %1018 = vmatpush1.msra.mxu0 %v955_v7  ;;  %v1739_v2 = vpop.f32.mrf.mxu0  ;;  %v939_v53 = vadd.f32 %v1594_v21, %v811_v12 }
 0x117   :  { %v1737_v34 = vmul.f32 %v732_v8, %v345_v25  ;;  %1019 = vmatprep.subr.mxu0 %v954_v11  ;;  %v938_v25 = vadd.f32 %v1592_v18, %v810_v54 }
 0x118   :  { %v1746_v52 = vpop.f32.mrf.mxu1  ;;  %1020 = vmatpush1.msra.mxu0 %v953_v5  ;;  %v1753_v0 = vpop.f32.mrf.mxu0  ;;  %v1994_v5 = vld [vmem:[#allocation9_spill] sm:$0xff] }
 0x119   :  { %1021 = vmatprep.subr.mxu0 %v952_v29  ;;  %v936_v8 = vadd.f32 %v1994_v5, %v808_v51 }
 0x11a   :  { %v1760_v6 = vpop.f32.mrf.mxu1  ;;  %1022 = vmatpush1.msra.mxu0 %v951_v4  ;;  %v1765_v62 = vpop.f32.mrf.mxu0 }
 0x11b   :  { %1023 = vmatprep.subr.mxu0 %v950_v35 }
 0x11c   :  { %v1770_v63 = vpop.f32.mrf.mxu1  ;;  %1024 = vmatpush1.msra.mxu0 %v949_v1  ;;  %v1775_v60 = vpop.f32.mrf.mxu0 }
 0x11d   :  { %1025 = vmatprep.subr.mxu0 %v948_v40 }
 0x11e   :  { %v1780_v3 = vpop.f32.mrf.mxu1  ;;  %1026 = vmatpush1.msra.mxu0 %v947_v38  ;;  %v1786_v16 = vpop.f32.mrf.mxu0 }
 0x11f   :  { %1027 = vmatprep.subr.mxu0 %v946_v17 }
 0x120   :  { %v1792_v57 = vpop.f32.mrf.mxu1  ;;  %1028 = vmatpush1.msra.mxu0 %v945_v19  ;;  %v1798_v36 = vpop.f32.mrf.mxu0 }
 0x121   :  { %1029 = vmatprep.subr.mxu0 %v944_v59 }
 0x122   :  { %v1804_v7 = vpop.f32.mrf.mxu1  ;;  %1030 = vmatpush1.msra.mxu0 %v943_v56  ;;  %v1810_v30 = vpop.f32.mrf.mxu0 }
 0x123   :  { %1031 = vmatprep.subr.mxu0 %v942_v28 }
 0x124   :  { %v1816_v11 = vpop.f32.mrf.mxu1  ;;  %1032 = vmatpush1.msra.mxu0 %v941_v55  ;;  %v1822_v24 = vpop.f32.mrf.mxu0 }
 0x125   :  { %1033 = vmatprep.subr.mxu0 %v940_v9 }
 0x126   :  { %v1825_v50 = vpop.f32.mrf.mxu1  ;;  %1034 = vmatpush1.msra.mxu0 %v939_v53  ;;  %v1828_v21 = vpop.f32.mrf.mxu0  ;;  %v870_v53 = vld [vmem:[%s1982_s1 + $0x1f8] sm:$0xff] }
 0x127   :  { %1035 = vmatprep.subr.mxu0 %v938_v25  ;;  %v869_v25 = vld [vmem:[%s1982_s1 + $0x1f0] sm:$0xff] }
 0x128   :  { %v1831_v29 = vpop.f32.mrf.mxu1  ;;  %1036 = vmatpush1.msra.mxu0 %v937_v49  ;;  %v1833_v18 = vpop.f32.mrf.mxu0  ;;  %v1997_v49 = vld [vmem:[#allocation7_spill] sm:$0xff] }
 0x129   :  { %1037 = vmatprep.subr.mxu0 %v936_v8 }
 0x12a   :  { %v1835_v45 = vpop.f32.mrf.mxu1  ;;  %1038 = vmatpush1.msra.mxu0 %v935_v48  ;;  %v1837_v15 = vpop.f32.mrf.mxu0 }
 0x12c   :  { %v1839_v46 = vpop.f32.mrf.mxu1  ;;  %v381_v4 = vpop.f32.mrf.mxu0 }
 0x12e   :  { %v768_v43 = vpop.f32.mrf.mxu1  ;;  %v385_v44 = vpop.f32.mrf.mxu0 }
 0x130   :  { %v772_v35 = vpop.f32.mrf.mxu1  ;;  %v387_v41 = vpop.f32.mrf.mxu0 }
 0x132   :  { %v774_v42 = vpop.f32.mrf.mxu1  ;;  %v391_v1 = vpop.f32.mrf.mxu0 }
 0x134   :  { %v778_v39 = vpop.f32.mrf.mxu1  ;;  %v393_v40 = vpop.f32.mrf.mxu0 }
 0x136   :  { %v780_v37 = vpop.f32.mrf.mxu1  ;;  %v397_v38 = vpop.f32.mrf.mxu0 }
 0x138   :  { %v784_v22 = vpop.f32.mrf.mxu1  ;;  %v399_v17 = vpop.f32.mrf.mxu0 }
 0x13a   :  { %v786_v61 = vpop.f32.mrf.mxu1  ;;  %v403_v19 = vpop.f32.mrf.mxu0 }
 0x13b   :  { %v928_v13 = vmul.f32 %v786_v61, %v399_v17  ;;  %v925_v17 = vmul.f32 %v778_v39, %v391_v1  ;;  %v862_v61 = vld [vmem:[%s1982_s1 + $0x1b8] sm:$0xff]  ;;  %v922_v1 = vmul.f32 %v768_v43, %v381_v4  ;;  %v857_v4 = vld [vmem:[%s1982_s1 + $0x190] sm:$0xff] }
 0x13c   :  { %v790_v58 = vpop.f32.mrf.mxu1  ;;  %v405_v59 = vpop.f32.mrf.mxu0 }
 0x13d   :  { %v929_v10 = vmul.f32 %v790_v58, %v403_v19  ;;  %v926_v19 = vmul.f32 %v780_v37, %v393_v40  ;;  %v863_v58 = vld [vmem:[%s1982_s1 + $0x1c0] sm:$0xff]  ;;  %v923_v40 = vmul.f32 %v772_v35, %v385_v44  ;;  %v860_v37 = vld [vmem:[%s1982_s1 + $0x1a8] sm:$0xff]  ;;  %v920_v35 = vmul.f32 %v1835_v45, %v1833_v18 }
 0x13e   :  { %v792_v26 = vpop.f32.mrf.mxu1  ;;  %v409_v56 = vpop.f32.mrf.mxu0  ;;  %v855_v18 = vld [vmem:[%s1982_s1 + $0x180] sm:$0xff] }
 0x13f   :  { %v930_v48 = vmul.f32 %v792_v26, %v405_v59  ;;  %v864_v59 = vld [vmem:[%s1982_s1 + $0x1c8] sm:$0xff]  ;;  %v990_v39 = vadd.f32 %v926_v19, %v862_v61  ;;  %v842_v19 = vld [vmem:[%s1982_s1 + $0x118] sm:$0xff] }
 0x140   :  { %v796_v12 = vpop.f32.mrf.mxu1  ;;  %v411_v54 = vpop.f32.mrf.mxu0  ;;  %v840_v61 = vld [vmem:[%s1982_s1 + $0x108] sm:$0xff] }
 0x141   :  { %v931_v8 = vmul.f32 %v796_v12, %v409_v56  ;;  %v865_v56 = vld [vmem:[%s1982_s1 + $0x1d0] sm:$0xff] }
 0x142   :  { %v798_v28 = vpop.f32.mrf.mxu1 }
 0x143   :  { %v932_v27 = vmul.f32 %v798_v28, %v411_v54  ;;  %v866_v28 = vld [vmem:[%s1982_s1 + $0x1d8] sm:$0xff] }
 0x144   :  { %v802_v55 = vpop.f32.mrf.mxu1 }
 0x145   :  { %v933_v9 = vmul.f32 %v802_v55, %v1996_v33  ;;  %v867_v55 = vld [vmem:[%s1982_s1 + $0x1e0] sm:$0xff]  ;;  %v996_v12 = vadd.f32 %v932_v27, %v868_v47  ;;  %v992_v27 = vadd.f32 %v928_v13, %v864_v59  ;;  %v858_v13 = vld [vmem:[%s1982_s1 + $0x198] sm:$0xff]  ;;  %v915_v47 = vmul.f32 %v1792_v57, %v1786_v16 }
 0x146   :  { %v804_v51 = vpop.f32.mrf.mxu1  ;;  %v995_v26 = vadd.f32 %v931_v8, %v867_v55  ;;  %v986_v45 = vadd.f32 %v922_v1, %v858_v13  ;;  %v916_v8 = vmul.f32 %v1804_v7, %v1798_v36  ;;  %v851_v36 = vld [vmem:[%s1982_s1 + $0x160] sm:$0xff]  ;;  %v913_v55 = vmul.f32 %v1770_v63, %v1765_v62  ;;  %v850_v16 = vld [vmem:[%s1982_s1 + $0x158] sm:$0xff]  ;;  %v848_v62 = vld [vmem:[%s1982_s1 + $0x148] sm:$0xff] }
 0x147   :  { %v934_v5 = vmul.f32 %v804_v51, %v1997_v49  ;;  %v997_v54 = vadd.f32 %v933_v9, %v869_v25  ;;  %v927_v51 = vmul.f32 %v784_v22, %v397_v38  ;;  %v994_v9 = vadd.f32 %v930_v48, %v866_v28  ;;  %v861_v22 = vld [vmem:[%s1982_s1 + $0x1b0] sm:$0xff]  ;;  %v843_v59 = vld [vmem:[%s1982_s1 + $0x120] sm:$0xff] }
 0x148   :  { %v924_v38 = vmul.f32 %v774_v42, %v387_v41  ;;  %v921_v41 = vmul.f32 %v1839_v46, %v1837_v15  ;;  %v989_v44 = vadd.f32 %v925_v17, %v861_v22  ;;  %v919_v42 = vmul.f32 %v1831_v29, %v1828_v21  ;;  %v856_v15 = vld [vmem:[%s1982_s1 + $0x188] sm:$0xff]  ;;  %v854_v21 = vld [vmem:[%s1982_s1 + $0x178] sm:$0xff] }
 0x149   :  { %v998_v33 = vadd.f32 %v934_v5, %v870_v53  ;;  %v993_v53 = vadd.f32 %v929_v10, %v865_v56  ;;  %v991_v25 = vadd.f32 %v927_v51, %v863_v58  ;;  %v859_v10 = vld [vmem:[%s1982_s1 + $0x1a0] sm:$0xff]  ;;  %v918_v49 = vmul.f32 %v1825_v50, %v1822_v24  ;;  %v853_v24 = vld [vmem:[%s1982_s1 + $0x170] sm:$0xff]  ;;  %v1998_v22 = vld [vmem:[#allocation11_spill] sm:$0xff] }
 0x14a   :  { %v988_v43 = vadd.f32 %v924_v38, %v860_v37  ;;  %v987_v46 = vadd.f32 %v923_v40, %v859_v10  ;;  %v917_v5 = vmul.f32 %v1816_v11, %v1810_v30  ;;  %v985_v29 = vadd.f32 %v921_v41, %v857_v4  ;;  %v852_v30 = vld [vmem:[%s1982_s1 + $0x168] sm:$0xff]  ;;  %v1002_v37 = vld [vmem:[%s1981_s0 + $0x18] sm:$0xff] }
 0x14b   :  { %1039 = vmatprep.subr.mxu0 %v998_v33  ;;  %v984_v50 = vadd.f32 %v920_v35, %v856_v15  ;;  %v983_v11 = vadd.f32 %v919_v42, %v855_v18  ;;  %v914_v48 = vmul.f32 %v1780_v3, %v1775_v60  ;;  %v982_v7 = vadd.f32 %v918_v49, %v854_v21  ;;  %v849_v60 = vld [vmem:[%s1982_s1 + $0x150] sm:$0xff] }
 0x14c   :  { %1040 = vmatpush2.msra.mxu0 %v997_v54  ;;  %v981_v57 = vadd.f32 %v917_v5, %v853_v24  ;;  %v912_v33 = vmul.f32 %v1760_v6, %v1753_v0  ;;  %v980_v3 = vadd.f32 %v916_v8, %v852_v30  ;;  %v911_v28 = vmul.f32 %v1746_v52, %v1739_v2  ;;  %v847_v54 = vld [vmem:[%s1982_s1 + $0x140] sm:$0xff]  ;;  %v846_v6 = vld [vmem:[%s1982_s1 + $0x138] sm:$0xff]  ;;  %v845_v2 = vld [vmem:[%s1982_s1 + $0x130] sm:$0xff] }
 0x14d   :  { %1041 = vmatprep.subr.mxu0 %v996_v12  ;;  %v979_v63 = vadd.f32 %v915_v47, %v851_v36  ;;  %v978_v0 = vadd.f32 %v914_v48, %v850_v16  ;;  %v977_v56 = vadd.f32 %v913_v55, %v849_v60  ;;  %v844_v12 = vld [vmem:[%s1982_s1 + $0x128] sm:$0xff]  ;;  %v973_v58 = vadd.f32 %v1725_v32, %v845_v2 }
 0x14e   :  { %1042 = vmatpush2.msra.mxu0 %v995_v26  ;;  %v976_v52 = vadd.f32 %v912_v33, %v848_v62  ;;  %v975_v51 = vadd.f32 %v911_v28, %v847_v54  ;;  %v974_v26 = vadd.f32 %v1737_v34, %v846_v6  ;;  %v972_v17 = vadd.f32 %v1713_v14, %v844_v12 }
 0x14f   :  { %1043 = vmatprep.subr.mxu0 %v994_v9  ;;  %v841_v9 = vld [vmem:[%s1982_s1 + $0x110] sm:$0xff]  ;;  %v971_v34 = vadd.f32 %v1701_v23, %v843_v59  ;;  %v970_v32 = vadd.f32 %v1689_v20, %v842_v19  ;;  %v968_v14 = vadd.f32 %v1998_v22, %v840_v61  ;;  %v999_v23 = vld [vmem:[%s1981_s0] sm:$0xff] }
 0x150   :  { %1044 = vmatpush2.msra.mxu0 %v993_v53  ;;  %v839_v53 = vld [vmem:[%s1982_s1 + $0x100] sm:$0xff]  ;;  %v969_v38 = vadd.f32 %v1681_v31, %v841_v9  ;;  %v1001_v31 = vld [vmem:[%s1981_s0 + $0x10] sm:$0xff] }
 0x151   :  { %1045 = vmatprep.subr.mxu0 %v992_v27  ;;  %v1999_v27 = vld [vmem:[#allocation10_spill] sm:$0xff] }
 0x152   :  { %1046 = vmatpush2.msra.mxu0 %v991_v25  ;;  %v967_v40 = vadd.f32 %v1999_v27, %v839_v53 }
 0x153   :  { %1047 = vmatprep.subr.mxu0 %v990_v39 }
 0x154   :  { %1048 = vmatpush2.msra.mxu0 %v989_v44 }
 0x155   :  { %1049 = vmatprep.subr.mxu0 %v988_v43 }
 0x156   :  { %1050 = vmatpush2.msra.mxu0 %v987_v46 }
 0x157   :  { %1051 = vmatprep.subr.mxu0 %v986_v45 }
 0x158   :  { %1052 = vmatpush2.msra.mxu0 %v985_v29 }
 0x159   :  { %1053 = vmatprep.subr.mxu0 %v984_v50 }
 0x15a   :  { %1054 = vmatpush2.msra.mxu0 %v983_v11 }
 0x15b   :  { %1055 = vmatprep.subr.mxu0 %v982_v7 }
 0x15c   :  { %1056 = vmatpush2.msra.mxu0 %v981_v57 }
 0x15d   :  { %1057 = vmatprep.subr.mxu0 %v980_v3 }
 0x15e   :  { %1058 = vmatpush2.msra.mxu0 %v979_v63 }
 0x15f   :  { %1059 = vmatprep.subr.mxu0 %v978_v0 }
 0x160   :  { %1060 = vmatpush2.msra.mxu0 %v977_v56 }
 0x161   :  { %1061 = vmatprep.subr.mxu0 %v976_v52 }
 0x162   :  { %1062 = vmatpush2.msra.mxu0 %v975_v51 }
 0x163   :  { %1063 = vmatprep.subr.mxu0 %v974_v26 }
 0x164   :  { %1064 = vmatpush2.msra.mxu0 %v973_v58 }
 0x165   :  { %1065 = vmatprep.subr.mxu0 %v972_v17 }
 0x166   :  { %1066 = vmatpush2.msra.mxu0 %v971_v34 }
 0x167   :  { %1067 = vmatprep.subr.mxu0 %v970_v32 }
 0x168   :  { %1068 = vmatpush2.msra.mxu0 %v969_v38 }
 0x169   :  { %1069 = vmatprep.subr.mxu0 %v968_v14 }
 0x16a   :  { %1070 = vmatpush2.msra.mxu0 %v967_v40 }
 0x16b   :  { %1072 = vmatmul.mubr.f32.vlgmr.msra.gmra.mxu0 %v999_v23 }
 0x16c   :  { %1077 = vmatprep.mubr.f32.mxu0 %v1002_v37 }
 0x16f   :  { %1078 = vmatmul.mubr.f32.gmra.mxu0 %v1001_v31 }
 0x22b   :  { %v1073_v20 = vpop.f32.mrf.mxu0 }
 0x22c   :  { %1099 = vst [vmem:[#allocation3] sm:$0xff] %v1073_v20 }
 0x22d   :  { %v1075_v25 = vpop.f32.mrf.mxu0 }
 0x22e   :  { %1100 = vst [vmem:[#allocation3 + $0x8] sm:$0xff] %v1075_v25 }
 0x22f   :  { %v1079_v1 = vpop.f32.mrf.mxu0 }
 0x230   :  { %1101 = vst [vmem:[#allocation3 + $0x10] sm:$0xff] %v1079_v1 }
 0x231   :  { %v1081_v10 = vpop.f32.mrf.mxu0 }
 0x232   :  { %1102 = vst [vmem:[#allocation3 + $0x18] sm:$0xff] %v1081_v10 }
 0x233   :  { %1200 = shalt.err (!%p1197_p4)
}
 0x234   :  { %s1213_s0 = smov 256   ;;  %s1214_s25 = smov 16  }
 0x235   :  { %1114 = dma.vmem_to_hbm [thread:$0]  %s1109_s23, 512, %s1987_s6, [#allocation4], %s1213_s0, %s1213_s0, %s1214_s25  }
 0x236   :  { %1209 = dma.done.wait [#allocation4], 512  }
 0x237   :  { %1210 = vsyncadd [#allocation4], 4294966784 }
 0x238   :  { %1118 = vsyncpa [#allocation4], 1 }

</bundles_post_ra>
